<compile_context>
chip_gen: v5e
topology: v5e:2x2
jax: 0.10.0
libtpu: 0.0.40
codegen_flags: <defaults>
</compile_context>

<pallas_src>
import functools

import jax
import jax.numpy as jnp
from jax import lax
from jax.experimental import pallas as pl
from jax.experimental.pallas import tpu as pltpu

DT = 0.001
V_TH = 1.0
V_LEAK = 0.0
V_RESET = 0.0


def _round_up(x, m):
    return ((x + m - 1) // m) * m


def snn_hidden_kernel(t_chunk,
                      xw_ref, w_rec_t_ref, dtm_ref, dts_ref,
                      spikes_ref, zf_ref, vf_ref, if_ref):
    """One grid step = `t_chunk` timesteps for one batch chunk.

    xw_ref    : (t_chunk, Bc, Hp)  precomputed x_t @ W_in^T (hoisted GEMM)
    w_rec_t   : (Hp, Hp)           recurrent weights, pre-transposed
    dtm/dts   : (1, Hp)            dt * clamp(tau_mem_inv/tau_syn_inv, 0, 1)
    spikes    : (t_chunk, Bc, Hp)  per-step output spikes
    zf/vf/if  : (Bc, Hp)           resident state carry == final LIF state
    """
    t = pl.program_id(1)

    # Initial state (s1=None in the PyTorch forward): z=0, v=v_leak, i=0.
    # The state outputs have a constant block index along t, so they stay
    # resident in VMEM across the whole sequential t loop (accumulator
    # pattern) and double as the state carry between chunks.
    @pl.when(t == 0)
    def _():
        zf_ref[...] = jnp.zeros_like(zf_ref)
        vf_ref[...] = jnp.full_like(vf_ref, V_LEAK)
        if_ref[...] = jnp.zeros_like(if_ref)

    bc, hp = zf_ref.shape
    # Broadcast (1,Hp) -> (Bc,Hp) once per chunk (JAX does not CSE broadcasts).
    dtm = jnp.broadcast_to(dtm_ref[...], (bc, hp))
    dts = jnp.broadcast_to(dts_ref[...], (bc, hp))
    w_rec_t = w_rec_t_ref[...]

    def step(k, carry):
        z, v, i = carry
        v_decayed = v + dtm * ((V_LEAK - v) + i)
        i_decayed = i - dts * i
        z_new = (v_decayed - V_TH > 0.0).astype(jnp.float32)
        v_new = (1.0 - z_new) * v_decayed + z_new * V_RESET
        # Input projection was hoisted to one big GEMM in the wrapper; only
        # the recurrent matmul remains on the serial critical path.
        i_new = (i_decayed
                 + xw_ref[k]
                 + jnp.dot(z, w_rec_t, preferred_element_type=jnp.float32))
        spikes_ref[k] = z_new
        return (z_new, v_new, i_new)

    carry0 = (zf_ref[...], vf_ref[...], if_ref[...])
    z_f, v_f, i_f = lax.fori_loop(0, t_chunk, step, carry0, unroll=True)

    # Write state back once per chunk (not once per timestep).
    zf_ref[...] = z_f
    vf_ref[...] = v_f
    if_ref[...] = i_f


@functools.partial(jax.jit, static_argnames=("t_chunk", "b_chunk"))
def snn_hidden_forward(x, w_in, w_rec, tau_syn_l1, tau_mem_l1,
                       *, t_chunk=16, b_chunk=None):
    """x: (batch, seq, hidden) float32.

    Returns (spikes (seq, batch, hidden), final state (z, v, i) each
    (batch, hidden)) — matching the PyTorch module's forward().
    """
    B, S, H = x.shape
    x = x.astype(jnp.float32)
    w_in = w_in.astype(jnp.float32)
    w_rec = w_rec.astype(jnp.float32)

    # --- Padded sizes: lane-dense hidden, sublane-dense batch. Zero padding is
    #     inert for LIF (zero input + zero weights keep padded rows/cols at 0).
    Hp = max(_round_up(H, 128), 128)
    if b_chunk is None:
        Bp = max(_round_up(B, 8), 8)
        bc = Bp
    else:
        bc = max(_round_up(b_chunk, 8), 8)
        Bp = _round_up(max(B, bc), bc)

    # --- Time chunking: tc must divide S (padding the time axis would evolve
    #     the final state past seq_length).
    tc = max(1, min(t_chunk, S))
    while S % tc:
        tc -= 1
    n_b = Bp // bc
    n_t = S // tc

    # --- Hoist the input projection: pad FIRST, then one large GEMM over all
    #     timesteps — the GEMM writes the padded (S,Bp,Hp) slab directly.
    x_sbh = jnp.transpose(x, (1, 0, 2))                          # (S, B, H)
    x_sbh = jnp.pad(x_sbh, ((0, 0), (0, Bp - B), (0, 0)))        # (S, Bp, H)
    w_in_p = jnp.pad(w_in, ((0, Hp - H), (0, 0)))                # (Hp, H)
    xw_p = jnp.dot(x_sbh.reshape(S * Bp, H), w_in_p.T,
                   precision=jax.lax.Precision.HIGHEST,
                   preferred_element_type=jnp.float32).reshape(S, Bp, Hp)

    w_rec_t_p = jnp.pad(jnp.transpose(w_rec), ((0, Hp - H), (0, Hp - H)))
    # Pre-clamp and pre-scale the inverse time constants (hoisted off the
    # per-step serial path).
    dt_tau_mem = jnp.pad(
        DT * jnp.clip(tau_mem_l1.astype(jnp.float32), 0.0, 1.0),
        ((0, 0), (0, Hp - H)))
    dt_tau_syn = jnp.pad(
        DT * jnp.clip(tau_syn_l1.astype(jnp.float32), 0.0, 1.0),
        ((0, 0), (0, Hp - H)))

    # Explicit VMEM budget (mainly for v7x's 64 MiB): double-buffered xW +
    # spikes blocks, W_rec^T + taus, resident state outputs.
    io_blk = tc * bc * Hp * 4
    est = (2 * io_blk + 2 * io_blk
           + 2 * Hp * Hp * 4
           + 4 * Hp * 4
           + 6 * bc * Hp * 4)
    vmem_limit = int(min(max(2 * est, 32 * 1024 * 1024), 120 * 1024 * 1024))

    grid_spec = pltpu.PrefetchScalarGridSpec(
        num_scalar_prefetch=0,
        grid=(n_b, n_t),                                   # (parallel, serial)
        in_specs=[
            pl.BlockSpec((tc, bc, Hp), lambda b, t: (t, b, 0)),   # xW
            pl.BlockSpec((Hp, Hp), lambda b, t: (0, 0)),          # W_rec^T
            pl.BlockSpec((1, Hp), lambda b, t: (0, 0)),           # dt*tau_mem
            pl.BlockSpec((1, Hp), lambda b, t: (0, 0)),           # dt*tau_syn
        ],
        out_specs=[
            pl.BlockSpec((tc, bc, Hp), lambda b, t: (t, b, 0)),   # spikes
            pl.BlockSpec((bc, Hp), lambda b, t: (b, 0)),          # final z
            pl.BlockSpec((bc, Hp), lambda b, t: (b, 0)),          # final v
            pl.BlockSpec((bc, Hp), lambda b, t: (b, 0)),          # final i
        ],
    )

    spikes_p, z_p, v_p, i_p = pl.pallas_call(
        functools.partial(snn_hidden_kernel, tc),
        grid_spec=grid_spec,
        out_shape=(
            jax.ShapeDtypeStruct((S, Bp, Hp), jnp.float32),
            jax.ShapeDtypeStruct((Bp, Hp), jnp.float32),
            jax.ShapeDtypeStruct((Bp, Hp), jnp.float32),
            jax.ShapeDtypeStruct((Bp, Hp), jnp.float32),
        ),
        compiler_params=pltpu.CompilerParams(
            # batch chunks are independent -> "parallel" (2 TCs on v7x);
            # the recurrence over time is sequential -> "arbitrary".
            dimension_semantics=("parallel", "arbitrary"),
            vmem_limit_bytes=vmem_limit),
    )(xw_p, w_rec_t_p, dt_tau_mem, dt_tau_syn)

    spikes = spikes_p[:, :B, :H]
    return spikes, (z_p[:B, :H], v_p[:B, :H], i_p[:B, :H])


def snn_hidden_reference(x, w_in, w_rec, tau_syn_l1, tau_mem_l1):
    """Pure-JAX reference (mirrors the PyTorch/norse loop) for validation."""
    B, S, H = x.shape
    x_sbh = jnp.transpose(x, (1, 0, 2))
    tau_syn_inv = jnp.clip(tau_syn_l1, 0.0, 1.0)
    tau_mem_inv = jnp.clip(tau_mem_l1, 0.0, 1.0)
    hi = jax.lax.Precision.HIGHEST

    def step(state, x_t):
        z, v, i = state
        v_decayed = v + DT * tau_mem_inv * ((V_LEAK - v) + i)
        i_decayed = i - DT * tau_syn_inv * i
        z_new = (v_decayed - V_TH > 0.0).astype(jnp.float32)
        v_new = (1.0 - z_new) * v_decayed + z_new * V_RESET
        i_new = (i_decayed
                 + jnp.dot(x_t, w_in.T, precision=hi)
                 + jnp.dot(z, w_rec.T, precision=hi))
        return (z_new, v_new, i_new), z_new

    init = (jnp.zeros((B, H)), jnp.full((B, H), V_LEAK), jnp.zeros((B, H)))
    (z_f, v_f, i_f), spikes = jax.lax.scan(step, init, x_sbh)
    return spikes, (z_f, v_f, i_f)


if __name__ == "__main__":
    # Small shapes implied by the module: input_features == hidden_features.
    B, S, H = 2, 8, 32

    key = jax.random.PRNGKey(0)
    k_x, k_win, k_wrec = jax.random.split(key, 3)

    x = jax.random.normal(k_x, (B, S, H), dtype=jnp.float32)
    # LIFRecurrentCell init: randn(H, H) * sqrt(2 / H)
    scale = jnp.sqrt(2.0 / H)
    w_in = jax.random.normal(k_win, (H, H), dtype=jnp.float32) * scale
    w_rec = jax.random.normal(k_wrec, (H, H), dtype=jnp.float32) * scale
    tau_syn_l1 = jnp.full((1, H), 0.1, dtype=jnp.float32)
    tau_mem_l1 = jnp.full((1, H), 0.05, dtype=jnp.float32)

    # t_chunk=2 forces several sequential grid steps so the resident-state
    # carry across chunks is exercised by the correctness check.
    spikes, (z_f, v_f, i_f) = snn_hidden_forward(
        x, w_in, w_rec, tau_syn_l1, tau_mem_l1, t_chunk=2)
    jax.block_until_ready((spikes, z_f, v_f, i_f))

    spikes_ref, (z_r, v_r, i_r) = snn_hidden_reference(
        x, w_in, w_rec, tau_syn_l1, tau_mem_l1)

    assert spikes.shape == (S, B, H)
    assert jnp.allclose(spikes, spikes_ref, atol=1e-5), "spike mismatch"
    assert jnp.allclose(v_f, v_r, atol=1e-4, rtol=1e-4), "final v mismatch"
    assert jnp.allclose(i_f, i_r, atol=1e-4, rtol=1e-4), "final i mismatch"
    assert jnp.allclose(z_f, z_r, atol=1e-5), "final z mismatch"

    print("KERNEL_OK")
</pallas_src>

<mosaic_0001>
module attributes {stable_mosaic.version = 11 : i64} {
  func.func @snn_hidden_kernel(%arg0: i32, %arg1: i32, %arg2: memref<2x8x128xf32, #tpu.memory_space<vmem>>, %arg3: memref<128x128xf32, #tpu.memory_space<vmem>>, %arg4: memref<1x128xf32, #tpu.memory_space<vmem>>, %arg5: memref<1x128xf32, #tpu.memory_space<vmem>>, %arg6: memref<2x8x128xf32, #tpu.memory_space<vmem>>, %arg7: memref<8x128xf32, #tpu.memory_space<vmem>>, %arg8: memref<8x128xf32, #tpu.memory_space<vmem>>, %arg9: memref<8x128xf32, #tpu.memory_space<vmem>>) attributes {dimension_semantics = [#tpu.dimension_semantics<parallel>, #tpu.dimension_semantics<arbitrary>], iteration_bounds = array<i64: 1, 4>, scalar_prefetch = 0 : i64, scratch_operands = 0 : i64, tpu.core_type = #tpu.core_type<tc>, window_params = [{transform_indices = @transform_0, window_bounds = array<i64: 2, 8, 128>}, {pipeline_mode = #tpu.pipeline_mode<synchronous>, transform_indices = @transform_1, window_bounds = array<i64: 128, 128>}, {pipeline_mode = #tpu.pipeline_mode<synchronous>, transform_indices = @transform_2, window_bounds = array<i64: 1, 128>}, {pipeline_mode = #tpu.pipeline_mode<synchronous>, transform_indices = @transform_3, window_bounds = array<i64: 1, 128>}, {transform_indices = @transform_4, window_bounds = array<i64: 2, 8, 128>}, {transform_indices = @transform_5, window_bounds = array<i64: 8, 128>}, {transform_indices = @transform_6, window_bounds = array<i64: 8, 128>}, {transform_indices = @transform_7, window_bounds = array<i64: 8, 128>}]} {
    %c0_i32 = arith.constant 0 : i32
    %0 = arith.cmpi eq, %arg1, %c0_i32 : i32
    %1 = arith.extui %0 : i1 to i32
    %c0_i32_0 = arith.constant 0 : i32
    %2 = arith.cmpi ne, %1, %c0_i32_0 : i32
    scf.if %2 {
      %cst_38 = arith.constant 0.000000e+00 : f32
      %74 = vector.broadcast %cst_38 : f32 to vector<8x128xf32>
      %c0_39 = arith.constant 0 : index
      %c0_40 = arith.constant 0 : index
      %75 = vector.load %arg7[%c0_39, %c0_40] : memref<8x128xf32, #tpu.memory_space<vmem>>, vector<8x128xf32>
      tpu.vector_store %arg7[%c0_39, %c0_40], %74 {strides = array<i32>} : memref<8x128xf32, #tpu.memory_space<vmem>>, vector<8x128xf32>,
      %cst_41 = arith.constant 0.000000e+00 : f32
      %76 = vector.broadcast %cst_41 : f32 to vector<8x128xf32>
      %c0_42 = arith.constant 0 : index
      %c0_43 = arith.constant 0 : index
      %77 = vector.load %arg8[%c0_42, %c0_43] : memref<8x128xf32, #tpu.memory_space<vmem>>, vector<8x128xf32>
      tpu.vector_store %arg8[%c0_42, %c0_43], %76 {strides = array<i32>} : memref<8x128xf32, #tpu.memory_space<vmem>>, vector<8x128xf32>,
      %cst_44 = arith.constant 0.000000e+00 : f32
      %78 = vector.broadcast %cst_44 : f32 to vector<8x128xf32>
      %c0_45 = arith.constant 0 : index
      %c0_46 = arith.constant 0 : index
      %79 = vector.load %arg9[%c0_45, %c0_46] : memref<8x128xf32, #tpu.memory_space<vmem>>, vector<8x128xf32>
      tpu.vector_store %arg9[%c0_45, %c0_46], %78 {strides = array<i32>} : memref<8x128xf32, #tpu.memory_space<vmem>>, vector<8x128xf32>,
    } else {
    }
    %c0 = arith.constant 0 : index
    %c0_1 = arith.constant 0 : index
    %3 = vector.load %arg4[%c0, %c0_1] : memref<1x128xf32, #tpu.memory_space<vmem>>, vector<1x128xf32>
    %4 = vector.shape_cast %3 : vector<1x128xf32> to vector<1x128xf32>
    %5 = vector.broadcast %4 : vector<1x128xf32> to vector<8x128xf32>
    %c0_2 = arith.constant 0 : index
    %c0_3 = arith.constant 0 : index
    %6 = vector.load %arg5[%c0_2, %c0_3] : memref<1x128xf32, #tpu.memory_space<vmem>>, vector<1x128xf32>
    %7 = vector.shape_cast %6 : vector<1x128xf32> to vector<1x128xf32>
    %8 = vector.broadcast %7 : vector<1x128xf32> to vector<8x128xf32>
    %c0_4 = arith.constant 0 : index
    %c0_5 = arith.constant 0 : index
    %9 = vector.load %arg3[%c0_4, %c0_5] : memref<128x128xf32, #tpu.memory_space<vmem>>, vector<128x128xf32>
    %c0_6 = arith.constant 0 : index
    %c0_7 = arith.constant 0 : index
    %10 = vector.load %arg7[%c0_6, %c0_7] : memref<8x128xf32, #tpu.memory_space<vmem>>, vector<8x128xf32>
    %c0_8 = arith.constant 0 : index
    %c0_9 = arith.constant 0 : index
    %11 = vector.load %arg8[%c0_8, %c0_9] : memref<8x128xf32, #tpu.memory_space<vmem>>, vector<8x128xf32>
    %c0_10 = arith.constant 0 : index
    %c0_11 = arith.constant 0 : index
    %12 = vector.load %arg9[%c0_10, %c0_11] : memref<8x128xf32, #tpu.memory_space<vmem>>, vector<8x128xf32>
    %c0_i32_12 = arith.constant 0 : i32
    %cst = arith.constant 0.000000e+00 : f32
    %13 = vector.broadcast %cst : f32 to vector<8x128xf32>
    %14 = arith.subf %13, %11 : vector<8x128xf32>
    %15 = arith.addf %14, %12 : vector<8x128xf32>
    %16 = arith.mulf %5, %15 : vector<8x128xf32>
    %17 = arith.addf %11, %16 : vector<8x128xf32>
    %18 = arith.mulf %8, %12 : vector<8x128xf32>
    %19 = arith.subf %12, %18 : vector<8x128xf32>
    %cst_13 = arith.constant 1.000000e+00 : f32
    %20 = vector.broadcast %cst_13 : f32 to vector<8x128xf32>
    %21 = arith.subf %17, %20 : vector<8x128xf32>
    %cst_14 = arith.constant 0.000000e+00 : f32
    %22 = vector.broadcast %cst_14 : f32 to vector<8x128xf32>
    %23 = arith.cmpf ogt, %21, %22 : vector<8x128xf32>
    %24 = arith.extui %23 : vector<8x128xi1> to vector<8x128xi32>
    %25 = arith.sitofp %24 : vector<8x128xi32> to vector<8x128xf32>
    %cst_15 = arith.constant 1.000000e+00 : f32
    %26 = vector.broadcast %cst_15 : f32 to vector<8x128xf32>
    %27 = arith.subf %26, %25 : vector<8x128xf32>
    %28 = arith.mulf %27, %17 : vector<8x128xf32>
    %cst_16 = arith.constant 0.000000e+00 : f32
    %29 = vector.broadcast %cst_16 : f32 to vector<8x128xf32>
    %30 = arith.mulf %25, %29 : vector<8x128xf32>
    %31 = arith.addf %28, %30 : vector<8x128xf32>
    %32 = arith.index_cast %c0_i32_12 : i32 to index
    %c0_17 = arith.constant 0 : index
    %c0_18 = arith.constant 0 : index
    %33 = vector.load %arg2[%32, %c0_17, %c0_18] : memref<2x8x128xf32, #tpu.memory_space<vmem>>, vector<1x8x128xf32>
    %34 = vector.shape_cast %33 : vector<1x8x128xf32> to vector<8x128xf32>
    %35 = arith.addf %19, %34 : vector<8x128xf32>
    %cst_19 = arith.constant dense<0.000000e+00> : vector<8x128xf32>
    %36 = tpu.matmul %10, %9, %cst_19 {dimension_numbers = #tpu.dot_dimension_numbers<[1], [0], [0], [1], [0, 0, 1, 1], [], []>} : vector<8x128xf32>, vector<128x128xf32>, vector<8x128xf32> -> vector<8x128xf32>
    %37 = arith.addf %35, %36 : vector<8x128xf32>
    %38 = arith.index_cast %c0_i32_12 : i32 to index
    %c0_20 = arith.constant 0 : index
    %c0_21 = arith.constant 0 : index
    %39 = vector.load %arg6[%38, %c0_20, %c0_21] : memref<2x8x128xf32, #tpu.memory_space<vmem>>, vector<1x8x128xf32>
    %40 = vector.shape_cast %39 : vector<1x8x128xf32> to vector<8x128xf32>
    %41 = vector.shape_cast %25 : vector<8x128xf32> to vector<1x8x128xf32>
    tpu.vector_store %arg6[%38, %c0_20, %c0_21], %41 {strides = array<i32>} : memref<2x8x128xf32, #tpu.memory_space<vmem>>, vector<1x8x128xf32>,
    %c1_i32 = arith.constant 1 : i32
    %cst_22 = arith.constant 0.000000e+00 : f32
    %42 = vector.broadcast %cst_22 : f32 to vector<8x128xf32>
    %43 = arith.subf %42, %31 : vector<8x128xf32>
    %44 = arith.addf %43, %37 : vector<8x128xf32>
    %45 = arith.mulf %5, %44 : vector<8x128xf32>
    %46 = arith.addf %31, %45 : vector<8x128xf32>
    %47 = arith.mulf %8, %37 : vector<8x128xf32>
    %48 = arith.subf %37, %47 : vector<8x128xf32>
    %cst_23 = arith.constant 1.000000e+00 : f32
    %49 = vector.broadcast %cst_23 : f32 to vector<8x128xf32>
    %50 = arith.subf %46, %49 : vector<8x128xf32>
    %cst_24 = arith.constant 0.000000e+00 : f32
    %51 = vector.broadcast %cst_24 : f32 to vector<8x128xf32>
    %52 = arith.cmpf ogt, %50, %51 : vector<8x128xf32>
    %53 = arith.extui %52 : vector<8x128xi1> to vector<8x128xi32>
    %54 = arith.sitofp %53 : vector<8x128xi32> to vector<8x128xf32>
    %cst_25 = arith.constant 1.000000e+00 : f32
    %55 = vector.broadcast %cst_25 : f32 to vector<8x128xf32>
    %56 = arith.subf %55, %54 : vector<8x128xf32>
    %57 = arith.mulf %56, %46 : vector<8x128xf32>
    %cst_26 = arith.constant 0.000000e+00 : f32
    %58 = vector.broadcast %cst_26 : f32 to vector<8x128xf32>
    %59 = arith.mulf %54, %58 : vector<8x128xf32>
    %60 = arith.addf %57, %59 : vector<8x128xf32>
    %61 = arith.index_cast %c1_i32 : i32 to index
    %c0_27 = arith.constant 0 : index
    %c0_28 = arith.constant 0 : index
    %62 = vector.load %arg2[%61, %c0_27, %c0_28] : memref<2x8x128xf32, #tpu.memory_space<vmem>>, vector<1x8x128xf32>
    %63 = vector.shape_cast %62 : vector<1x8x128xf32> to vector<8x128xf32>
    %64 = arith.addf %48, %63 : vector<8x128xf32>
    %cst_29 = arith.constant dense<0.000000e+00> : vector<8x128xf32>
    %65 = tpu.matmul %25, %9, %cst_29 {dimension_numbers = #tpu.dot_dimension_numbers<[1], [0], [0], [1], [0, 0, 1, 1], [], []>} : vector<8x128xf32>, vector<128x128xf32>, vector<8x128xf32> -> vector<8x128xf32>
    %66 = arith.addf %64, %65 : vector<8x128xf32>
    %67 = arith.index_cast %c1_i32 : i32 to index
    %c0_30 = arith.constant 0 : index
    %c0_31 = arith.constant 0 : index
    %68 = vector.load %arg6[%67, %c0_30, %c0_31] : memref<2x8x128xf32, #tpu.memory_space<vmem>>, vector<1x8x128xf32>
    %69 = vector.shape_cast %68 : vector<1x8x128xf32> to vector<8x128xf32>
    %70 = vector.shape_cast %54 : vector<8x128xf32> to vector<1x8x128xf32>
    tpu.vector_store %arg6[%67, %c0_30, %c0_31], %70 {strides = array<i32>} : memref<2x8x128xf32, #tpu.memory_space<vmem>>, vector<1x8x128xf32>,
    %c2_i32 = arith.constant 2 : i32
    %c0_32 = arith.constant 0 : index
    %c0_33 = arith.constant 0 : index
    %71 = vector.load %arg7[%c0_32, %c0_33] : memref<8x128xf32, #tpu.memory_space<vmem>>, vector<8x128xf32>
    tpu.vector_store %arg7[%c0_32, %c0_33], %54 {strides = array<i32>} : memref<8x128xf32, #tpu.memory_space<vmem>>, vector<8x128xf32>,
    %c0_34 = arith.constant 0 : index
    %c0_35 = arith.constant 0 : index
    %72 = vector.load %arg8[%c0_34, %c0_35] : memref<8x128xf32, #tpu.memory_space<vmem>>, vector<8x128xf32>
    tpu.vector_store %arg8[%c0_34, %c0_35], %60 {strides = array<i32>} : memref<8x128xf32, #tpu.memory_space<vmem>>, vector<8x128xf32>,
    %c0_36 = arith.constant 0 : index
    %c0_37 = arith.constant 0 : index
    %73 = vector.load %arg9[%c0_36, %c0_37] : memref<8x128xf32, #tpu.memory_space<vmem>>, vector<8x128xf32>
    tpu.vector_store %arg9[%c0_36, %c0_37], %66 {strides = array<i32>} : memref<8x128xf32, #tpu.memory_space<vmem>>, vector<8x128xf32>,
    return
  }
  func.func @transform_0(%arg0: i32, %arg1: i32) -> (i32, i32, i32) {
    %c0_i32 = arith.constant 0 : i32
    %c0_i32_0 = arith.constant 0 : i32
    return %arg1, %arg0, %c0_i32 : i32, i32, i32
  }
  func.func @transform_1(%arg0: i32, %arg1: i32) -> (i32, i32) {
    %c0_i32 = arith.constant 0 : i32
    %c0_i32_0 = arith.constant 0 : i32
    %c0_i32_1 = arith.constant 0 : i32
    return %c0_i32, %c0_i32_0 : i32, i32
  }
  func.func @transform_2(%arg0: i32, %arg1: i32) -> (i32, i32) {
    %c0_i32 = arith.constant 0 : i32
    %c0_i32_0 = arith.constant 0 : i32
    %c0_i32_1 = arith.constant 0 : i32
    return %c0_i32, %c0_i32_0 : i32, i32
  }
  func.func @transform_3(%arg0: i32, %arg1: i32) -> (i32, i32) {
    %c0_i32 = arith.constant 0 : i32
    %c0_i32_0 = arith.constant 0 : i32
    %c0_i32_1 = arith.constant 0 : i32
    return %c0_i32, %c0_i32_0 : i32, i32
  }
  func.func @transform_4(%arg0: i32, %arg1: i32) -> (i32, i32, i32) {
    %c0_i32 = arith.constant 0 : i32
    %c0_i32_0 = arith.constant 0 : i32
    return %arg1, %arg0, %c0_i32 : i32, i32, i32
  }
  func.func @transform_5(%arg0: i32, %arg1: i32) -> (i32, i32) {
    %c0_i32 = arith.constant 0 : i32
    %c0_i32_0 = arith.constant 0 : i32
    return %arg0, %c0_i32 : i32, i32
  }
  func.func @transform_6(%arg0: i32, %arg1: i32) -> (i32, i32) {
    %c0_i32 = arith.constant 0 : i32
    %c0_i32_0 = arith.constant 0 : i32
    return %arg0, %c0_i32 : i32, i32
  }
  func.func @transform_7(%arg0: i32, %arg1: i32) -> (i32, i32) {
    %c0_i32 = arith.constant 0 : i32
    %c0_i32_0 = arith.constant 0 : i32
    return %arg0, %c0_i32 : i32, i32
  }
}

</mosaic_0001>

<bundles_post_ra>
// kernel: snn_hidden_forward.1
= control target key start
LH: loop header
LB: loop body
LE: loop exit
PB: predicated region body
PF: predicated region fallthrough
CT: control target
= control target key end

     0   :  { %s739_s24 = smov 0   ;;  %s741_s25 = smov 0   ;;  %s867_s0 = inlined_call_operand.vmem [shape: f32[8,8,128], index: 0, kind: input, shape index: {}]   ;;  %s868_s1 = inlined_call_operand.vmem [shape: f32[128,128], index: 1, kind: input, shape index: {}]   ;;  %s869_s2 = inlined_call_operand.vmem [shape: f32[1,128], index: 2, kind: input, shape index: {}]   ;;  %s870_s3 = inlined_call_operand.vmem [shape: f32[1,128], index: 3, kind: input, shape index: {}]   ;;  %s871_s4 = inlined_call_operand.vmem [shape: f32[8,8,128], index: 4, kind: output, shape index: {0}]   ;;  %s872_s5 = inlined_call_operand.vmem [shape: f32[8,128], index: 5, kind: output, shape index: {1}]   ;;  %s873_s6 = inlined_call_operand.vmem [shape: f32[8,128], index: 6, kind: output, shape index: {2}]   ;;  %s874_s7 = inlined_call_operand.vmem [shape: f32[8,128], index: 7, kind: output, shape index: {3}]  }
   0x1   :  { %s743_s26 = smov 0  }
   0x2 LB: > { %s27_s27 = sadd.s32 1, %s690_s25  ;;  %p625_p0 = scmp.ge.s32.totalorder %s694_s26, 1  ;;  %s694_s26 = sphi %s743_s26, %s18_s26   ;;  %s690_s25 = sphi %s741_s25, %s876_s25   ;;  %s686_s24 = sphi %s739_s24, %s875_s24  }
   0x3   : > { %p28_p1 = scmp.ge.s32.totalorder %s27_s27, 4  ;;  %p264_p2 = scmp.lt.s32.totalorder %s694_s26, 5 }
   0x5   : > { %s878_s27 = smov (%p28_p1, %s27_s27), 0  ;;  %p265_p3 = pnand %p625_p0, %p264_p2 }
   0x6   : > { %s626_s28 = sshll.u32 (!%p265_p3), %s686_s24, 1  ;;  %p630_p5 = scmp.ne.s32.totalorder (!%p265_p3), %s686_s24, 0 }
   0x7   : > { %268 = sbr.rel (%p265_p3) target bundleno = 198 (0xc6), region = 36  ;;  %p315_p4 = scmp.lt.s32.totalorder (!%p265_p3), %s626_s28, 7 }
   0xc   : > { %s880_s28 = smov (!%p315_p4, %s626_s28), 7  ;;  %347 = sbr.rel (%p630_p5) target bundleno = 21 (0x15), region = 40 }
   0xd   : > { %s627_s29 = sshll.u32 %s880_s28, 3 }
   0xe   : > { %s760_s9 = scalar_lea.vmem %s867_s0, %s627_s29  ;;  %s765_s12 = scalar_lea.vmem %s871_s4, %s627_s29 }
  0x11   : > { %v696_v0 = vmov 0.0  }
  0x12   : > { %348 = vst [vmem:[%s872_s5] sm:$0xff] %v696_v0 }
  0x13   : > { %349 = vst [vmem:[%s873_s6] sm:$0xff] %v696_v0 }
  0x14   : > { %350 = vst [vmem:[%s874_s7] sm:$0xff] %v696_v0 }
  0x15 PF: > { %v374_v1 = vld [vmem:[%s868_s1 + $0x78] sm:$0xff]  ;;  %v373_v2 = vld [vmem:[%s868_s1 + $0x70] sm:$0xff]  ;;  %v372_v3 = vld [vmem:[%s868_s1 + $0x68] sm:$0xff]  ;;  %v697_v20 = vmov 0.0   ;;  %v698_v32 = vmov 1.0  }
  0x16   : > { %394 = vmatpush.msra.mxu0 %v374_v1  ;;  %433 = vmatpush.msra.mxu1 %v374_v1  ;;  %v371_v4 = vld [vmem:[%s868_s1 + $0x60] sm:$0xff]  ;;  %v370_v5 = vld [vmem:[%s868_s1 + $0x58] sm:$0xff]  ;;  %v369_v10 = vld [vmem:[%s868_s1 + $0x50] sm:$0xff] }
  0x17   : > { %v800_v8 = vld [vmem:[%s869_s2] ss:$0 sm:$0xff]  ;;  %v368_v12 = vld [vmem:[%s868_s1 + $0x48] sm:$0xff]  ;;  %v366_v16 = vld [vmem:[%s868_s1 + $0x38] sm:$0xff] }
  0x18   : > { %395 = vmatpush.msra.mxu0 %v373_v2  ;;  %434 = vmatpush.msra.mxu1 %v373_v2  ;;  %v367_v14 = vld [vmem:[%s868_s1 + $0x40] sm:$0xff]  ;;  %v365_v18 = vld [vmem:[%s868_s1 + $0x30] sm:$0xff]  ;;  %v364_v19 = vld [vmem:[%s868_s1 + $0x28] sm:$0xff] }
  0x19   : > { %v363_v24 = vld [vmem:[%s868_s1 + $0x20] sm:$0xff]  ;;  %v362_v26 = vld [vmem:[%s868_s1 + $0x18] sm:$0xff]  ;;  %v361_v28 = vld [vmem:[%s868_s1 + $0x10] sm:$0xff] }
  0x1a   : > { %396 = vmatpush.msra.mxu0 %v372_v3  ;;  %435 = vmatpush.msra.mxu1 %v372_v3  ;;  %v376_v6 = vld [vmem:[%s873_s6] sm:$0xff]  ;;  %v360_v29 = vld [vmem:[%s868_s1 + $0x8] sm:$0xff] }
  0x1b   : > { %v377_v7 = vld [vmem:[%s874_s7] sm:$0xff]  ;;  %v378_v9 = vsub.f32 0.0, %v376_v6  ;;  %v635_v43 = vld [vmem:[%s760_s9 + $0x8] sm:$0xff] }
  0x1c   : > { %397 = vmatpush.msra.mxu0 %v371_v4  ;;  %436 = vmatpush.msra.mxu1 %v371_v4  ;;  %v359_v30 = vld [vmem:[%s868_s1] sm:$0xff] }
  0x1d   : > { %v379_v11 = vadd.f32 %v378_v9, %v377_v7  ;;  %v375_v31 = vld [vmem:[%s872_s5] sm:$0xff] }
  0x1e   : > { %398 = vmatpush.msra.mxu0 %v370_v5  ;;  %437 = vmatpush.msra.mxu1 %v370_v5  ;;  %v671_v33 = vld [vmem:[%s870_s3] ss:$0 sm:$0xff] }
  0x1f   : > { %v380_v13 = vmul.f32 %v800_v8, %v379_v11  ;;  %v382_v34 = vmul.f32 %v671_v33, %v377_v7  ;;  %v392_v36 = vld [vmem:[%s760_s9] sm:$0xff] }
  0x20   : > { %399 = vmatpush.msra.mxu0 %v369_v10  ;;  %438 = vmatpush.msra.mxu1 %v369_v10 }
  0x21   : > { %v381_v15 = vadd.f32 %v380_v13, %v376_v6  ;;  %v383_v35 = vsub.f32 %v377_v7, %v382_v34 }
  0x22   : > { %400 = vmatpush.msra.mxu0 %v368_v12  ;;  %439 = vmatpush.msra.mxu1 %v368_v12 }
  0x23   : > { %v631_v17 = vadd.f32 -1.0, %v381_v15  ;;  %v393_v37 = vadd.f32 %v392_v36, %v383_v35 }
  0x24   : > { %401 = vmatpush.msra.mxu0 %v367_v14  ;;  %440 = vmatpush.msra.mxu1 %v367_v14 }
  0x25   : > { %vm385_vm0 = vcmp.gt.f32.partialorder %v631_v17, 0.0 }
  0x26   : > { %402 = vmatpush.msra.mxu0 %v366_v16  ;;  %441 = vmatpush.msra.mxu1 %v366_v16  ;;  %v632_v21 = vsel %vm385_vm0, 1.0, %v697_v20 }
  0x27   : > { %v388_v22 = vsub.f32 1.0, %v632_v21  ;;  %v390_v23 = vmul.f32 0.0, %v632_v21  ;;  %415 = vst [vmem:[%s765_s12] sm:$0xff] %v632_v21 }
  0x28   : > { %403 = vmatpush.msra.mxu0 %v365_v18  ;;  %442 = vmatpush.msra.mxu1 %v365_v18 }
  0x29   : > { %v389_v25 = vmul.f32 %v388_v22, %v381_v15 }
  0x2a   : > { %404 = vmatpush.msra.mxu0 %v364_v19  ;;  %443 = vmatpush.msra.mxu1 %v364_v19 }
  0x2b   : > { %v391_v27 = vadd.f32 %v390_v23, %v389_v25 }
  0x2c   : > { %405 = vmatpush.msra.mxu0 %v363_v24  ;;  %444 = vmatpush.msra.mxu1 %v363_v24 }
  0x2d   : > { %v416_v38 = vsub.f32 0.0, %v391_v27 }
  0x2e   : > { %406 = vmatpush.msra.mxu0 %v362_v26  ;;  %445 = vmatpush.msra.mxu1 %v362_v26 }
  0x30   : > { %407 = vmatpush.msra.mxu0 %v361_v28  ;;  %446 = vmatpush.msra.mxu1 %v361_v28 }
  0x32   : > { %408 = vmatpush.msra.mxu0 %v360_v29  ;;  %447 = vmatpush.msra.mxu1 %v360_v29 }
  0x34   : > { %409 = vmatpush.msra.mxu0 %v359_v30  ;;  %448 = vmatpush.msra.mxu1 %v359_v30 }
  0x35   : > { %410 = vmatmul.f32.vlgmr.msra.gmra.mxu0 %v375_v31  ;;  %636 = vmatmul.msk.f32.vlgmr.msra.gmra.mxu1 %vm385_vm0, %v698_v32 }
  0xb2   : > { %v411_v39 = vpop.f32.mrf.mxu0  ;;  %v450_v46 = vpop.f32.mrf.mxu1 }
  0xb3   : > { %v414_v40 = vadd.f32 %v411_v39, %v393_v37 }
  0xb5   : > { %v417_v41 = vadd.f32 %v416_v38, %v414_v40  ;;  %v420_v42 = vmul.f32 %v671_v33, %v414_v40 }
  0xb7   : > { %v418_v44 = vmul.f32 %v800_v8, %v417_v41  ;;  %v421_v45 = vsub.f32 %v414_v40, %v420_v42 }
  0xb9   : > { %v419_v47 = vadd.f32 %v418_v44, %v391_v27  ;;  %v432_v48 = vadd.f32 %v635_v43, %v421_v45 }
  0xbb   : > { %v633_v49 = vadd.f32 -1.0, %v419_v47  ;;  %v453_v50 = vadd.f32 %v450_v46, %v432_v48 }
  0xbd   : > { %vm423_vm1 = vcmp.gt.f32.partialorder %v633_v49, 0.0  ;;  %458 = vst [vmem:[%s874_s7] sm:$0xff] %v453_v50 }
  0xbe   : > { %v634_v51 = vsel %vm423_vm1, 1.0, %v697_v20 }
  0xbf   : > { %v426_v52 = vsub.f32 1.0, %v634_v51  ;;  %637 = vst [vmem:[%s765_s12 + $0x8] sm:$0xff] %v634_v51  ;;  %v428_v54 = vmul.f32 0.0, %v634_v51 }
  0xc0   : > { %456 = vst [vmem:[%s872_s5] sm:$0xff] %v634_v51 }
  0xc1   : > { %v427_v53 = vmul.f32 %v426_v52, %v419_v47 }
  0xc3   : > { %v429_v55 = vadd.f32 %v428_v54, %v427_v53 }
  0xc5   : > { %457 = vst [vmem:[%s873_s6] sm:$0xff] %v429_v55 }
  0xc6 PF: > { %s18_s26 = sadd.s32 1, %s694_s26   ;;  %s875_s24 = smov %s690_s25 }
  0xc7   : > { %p15_p6 = scmp.ge.s32.totalorder %s18_s26, 6   ;;  %s876_s25 = smov %s878_s27 }
  0xc9   :  { %17 = sbr.rel (!%p15_p6) target bundleno = 2 (0x2), region = 108 }

</bundles_post_ra>
